<compile_context>
chip_gen: v7x
topology: tpu7x:2x2x1
jax: 0.10.0
libtpu: 0.0.40
codegen_flags: <defaults>
</compile_context>

<pallas_src>
import functools
import math

import jax
import jax.numpy as jnp
from jax.experimental import pallas as pl
from jax.experimental.pallas import tpu as pltpu

_INV_SQRT2 = 1.0 / math.sqrt(2.0)


def _gelu_exact(h):
    # nn.GELU() default = exact (erf-based) GELU.
    return 0.5 * h * (1.0 + jax.lax.erf(h * _INV_SQRT2))


def _round_up(v, m):
    return ((v + m - 1) // m) * m


def _sublane_multiple(dtype):
    # f32 -> 8, bf16 -> 16, int8/fp8 -> 32 (sub-32-bit packs along sublanes).
    return max(8, 32 // jnp.dtype(dtype).itemsize)


def _padded_2d_bytes(shape, dtype):
    r, c = int(shape[0]), int(shape[1])
    return (_round_up(r, _sublane_multiple(dtype)) * _round_up(c, 128)
            * jnp.dtype(dtype).itemsize)


def _chip_vmem_capacity_bytes():
    try:
        cap = int(pltpu.get_tpu_info().vmem_capacity_bytes)
        if cap > 0:
            return cap
    except Exception:
        pass
    return 64 << 20  # conservative default (v7x per-core VMEM)


# ---------------------------------------------------------------------------
# Single-pass kernel: one block of `bb` whole images, (bb, C, HW).
# ---------------------------------------------------------------------------
def _ca_fused_kernel(x_ref, w1_ref, w2_ref, o_ref, *, hw, bb):
    # x_ref/o_ref: (bb, C, HW); w1: (Cr, C); w2: (C, Cr)
    x = x_ref[...]
    s = jnp.sum(x, axis=2, dtype=jnp.float32)                  # (bb, C), f32 accumulation
    m = jnp.max(x, axis=2).astype(jnp.float32)                 # (bb, C)
    pooled = jnp.concatenate([s * (1.0 / hw), m], axis=0)      # (2*bb, C)

    w1 = w1_ref[...].astype(jnp.float32)                       # (Cr, C)
    w2 = w2_ref[...].astype(jnp.float32)                       # (C, Cr)
    h = jnp.einsum('nc,rc->nr', pooled, w1,
                   preferred_element_type=jnp.float32)         # (2*bb, Cr)
    h = _gelu_exact(h)
    out = jnp.einsum('nr,cr->nc', h, w2,
                     preferred_element_type=jnp.float32)       # (2*bb, C)

    att = jax.nn.sigmoid(out[:bb] + out[bb:])                  # (bb, C)
    # Multiply kept in the input dtype (attention cast down, no f32 tile copy).
    o_ref[...] = x_ref[...] * att[:, :, None].astype(o_ref.dtype)


# ---------------------------------------------------------------------------
# Two-pass HW-tiled fallback (with batch folding bb2).
# ---------------------------------------------------------------------------
def _pool_att_kernel(x_ref, w1_ref, w2_ref, att_ref, sum_sc, max_sc,
                     *, hw, t_hw, bb):
    # x_ref: (bb, C, t_hw); att_ref: (bb, C, 1) f32; scratches: (bb, C) f32.
    t = pl.program_id(1)

    @pl.when(t == 0)
    def _():
        sum_sc[...] = jnp.zeros_like(sum_sc)
        max_sc[...] = jnp.full_like(max_sc, -jnp.inf)

    x = x_ref[...]
    if hw % t_hw == 0:   # static branch: tile divides HW, no masking needed
        part_sum = jnp.sum(x, axis=2, dtype=jnp.float32)
        part_max = jnp.max(x, axis=2).astype(jnp.float32)
    else:                # mask padded/garbage lanes: 0 for sum, -inf for max
        lane = jax.lax.broadcasted_iota(jnp.int32, x.shape, 2)
        valid = (t * t_hw + lane) < hw
        zero = jnp.zeros((), dtype=x.dtype)
        neg = jnp.asarray(-jnp.inf, dtype=x.dtype)
        part_sum = jnp.sum(jnp.where(valid, x, zero), axis=2, dtype=jnp.float32)
        part_max = jnp.max(jnp.where(valid, x, neg), axis=2).astype(jnp.float32)
    sum_sc[...] += part_sum
    max_sc[...] = jnp.maximum(max_sc[...], part_max)

    @pl.when(t == pl.num_programs(1) - 1)
    def _():
        pooled = jnp.concatenate([sum_sc[...] * (1.0 / hw), max_sc[...]],
                                 axis=0)                            # (2*bb, C)
        w1 = w1_ref[...].astype(jnp.float32)
        w2 = w2_ref[...].astype(jnp.float32)
        h = _gelu_exact(jnp.einsum('nc,rc->nr', pooled, w1,
                                   preferred_element_type=jnp.float32))
        out = jnp.einsum('nr,cr->nc', h, w2,
                         preferred_element_type=jnp.float32)        # (2*bb, C)
        att_ref[...] = jax.nn.sigmoid(out[:bb] + out[bb:])[:, :, None]


def _scale_kernel(x_ref, att_ref, o_ref):
    # x_ref/o_ref: (bb, C, t_hw); att_ref: (bb, C, 1) f32.
    o_ref[...] = x_ref[...] * att_ref[...].astype(o_ref.dtype)


# ---------------------------------------------------------------------------
# Wrapper
# ---------------------------------------------------------------------------
def channel_attention(x, w1, w2, *, vmem_budget_bytes=None):
    """x: (B, C, H, W) NCHW; w1: (Cr, C); w2: (C, Cr).  Returns (B, C, H, W)."""
    B, C, H, W = x.shape
    Cr = int(w1.shape[0])
    HW = H * W
    xr = x.reshape(B, C, HW)

    itemsize = jnp.dtype(x.dtype).itemsize
    C_pad = _round_up(C, _sublane_multiple(x.dtype))
    hw_pad = _round_up(HW, 128)
    per_image = C_pad * hw_pad * itemsize                   # padded VMEM footprint
    w_bytes = _padded_2d_bytes(w1.shape, w1.dtype) + _padded_2d_bytes(w2.shape, w2.dtype)
    w_hbm_bytes = int(w1.size) * w1.dtype.itemsize + int(w2.size) * w2.dtype.itemsize
    margin = 2 << 20  # headroom for Mosaic internal scratch / semaphores

    capacity = _chip_vmem_capacity_bytes()
    if vmem_budget_bytes is None:
        vmem_budget_bytes = max(32 << 20, capacity - (16 << 20))
    budget = int(min(int(vmem_budget_bytes), capacity - (2 << 20)))

    fits_db = 4 * per_image + 2 * w_bytes + margin <= budget   # double-buffered out
    fits_sb = 3 * per_image + 2 * w_bytes + margin <= budget   # single-buffered out

    # ---------------- Single-pass path: whole image(s) per block -------------
    if fits_db or fits_sb:
        out_bufs = 2 if fits_db else 1
        bufs = 2 + out_bufs
        max_bb = max(1, (budget - 2 * w_bytes - margin) // (bufs * per_image))
        # Keep >= 4 grid steps when B >= 4 (2 per TC on v7x megacore, 2-4
        # pipelined steps on single-core chips); never collapse to grid=1.
        cap = max(1, B // 4) if B >= 4 else 1
        cap = max(1, min(cap, int(max_bb)))
        bb = 1
        for cand in range(cap, 0, -1):
            if B % cand == 0:
                bb = cand
                break

        vmem_limit = bufs * bb * per_image + 2 * w_bytes + margin
        vmem_limit = int(min(max(vmem_limit, 8 << 20), capacity - (1 << 20)))

        if out_bufs == 2:
            out_spec = pl.BlockSpec((bb, C, HW), lambda i: (i, 0, 0))
        else:
            out_spec = pl.BlockSpec((bb, C, HW), lambda i: (i, 0, 0),
                                    pipeline_mode=pl.Buffered(1))

        cost = pl.CostEstimate(
            flops=int(3 * B * C * HW + 8 * B * Cr * C),
            transcendentals=int(2 * B * (Cr + C)),
            bytes_accessed=int(2 * B * C * HW * itemsize + w_hbm_bytes))

        out = pl.pallas_call(
            functools.partial(_ca_fused_kernel, hw=HW, bb=bb),
            out_shape=jax.ShapeDtypeStruct((B, C, HW), x.dtype),
            grid_spec=pltpu.PrefetchScalarGridSpec(
                num_scalar_prefetch=0,
                grid=(B // bb,),
                in_specs=[
                    pl.BlockSpec((bb, C, HW), lambda i: (i, 0, 0)),
                    pl.BlockSpec((Cr, C), lambda i: (0, 0)),
                    pl.BlockSpec((C, Cr), lambda i: (0, 0)),
                ],
                out_specs=out_spec,
            ),
            compiler_params=pltpu.CompilerParams(
                dimension_semantics=("parallel",),
                vmem_limit_bytes=vmem_limit),
            cost_estimate=cost,
        )(xr, w1, w2)
        return out.reshape(B, C, H, W)

    # ---------------- Two-pass HW-tiled fallback ------------------------------
    # Largest 128-multiple lane tile that fits the budget (prefer 512-2048
    # lanes); keep a dividing tile only if it is still >= 512 lanes, otherwise
    # use the masked ragged last tile.
    max_t = (budget - margin - 2 * w_bytes) // max(1, 4 * C_pad * itemsize)
    max_t = max(128, (int(max_t) // 128) * 128)
    t_cap = max(128, min(max_t, 2048, hw_pad))
    t_hw = t_cap
    if HW % 128 == 0 and t_cap < HW:
        best_div = 0
        d = 128
        while d <= min(t_cap, HW):
            if HW % d == 0:
                best_div = d
            d += 128
        if best_div >= 512:
            t_hw = best_div
    nt = pl.cdiv(HW, t_hw)

    # Batch folding so each DMA is at least a few hundred KiB for skinny C.
    block_bytes_1 = C_pad * t_hw * itemsize
    target_block = 512 << 10
    max_bb2 = max(1, (budget - margin - 2 * w_bytes) // max(1, 4 * block_bytes_1))
    want_bb2 = max(1, -(-target_block // block_bytes_1))
    cap2 = max(1, B // 2) if B >= 2 else 1
    bb2_cap = max(1, min(int(max_bb2), int(want_bb2), cap2))
    bb2 = 1
    for cand in range(bb2_cap, 0, -1):
        if B % cand == 0:
            bb2 = cand
            break

    tile_bytes = bb2 * C_pad * t_hw * itemsize
    att_block_bytes = bb2 * C_pad * 128 * 4
    scratch_bytes = 2 * _round_up(bb2, 8) * _round_up(C, 128) * 4

    p1_limit = 2 * tile_bytes + 2 * w_bytes + 2 * att_block_bytes + scratch_bytes + margin
    p1_limit = int(min(max(p1_limit, 8 << 20), capacity - (1 << 20)))
    p2_limit = 4 * tile_bytes + 2 * att_block_bytes + margin
    p2_limit = int(min(max(p2_limit, 8 << 20), capacity - (1 << 20)))

    cost1 = pl.CostEstimate(
        flops=int(2 * B * C * HW + 8 * B * Cr * C),
        transcendentals=int(2 * B * (Cr + C)),
        bytes_accessed=int(B * C * HW * itemsize + B * C * 4 + w_hbm_bytes))
    cost2 = pl.CostEstimate(
        flops=int(B * C * HW),
        transcendentals=0,
        bytes_accessed=int(2 * B * C * HW * itemsize + B * C * 4))

    # Pass 1: pooled stats + FC -> per-image attention (B, C, 1), f32.
    att = pl.pallas_call(
        functools.partial(_pool_att_kernel, hw=HW, t_hw=t_hw, bb=bb2),
        out_shape=jax.ShapeDtypeStruct((B, C, 1), jnp.float32),
        grid_spec=pltpu.PrefetchScalarGridSpec(
            num_scalar_prefetch=0,
            grid=(B // bb2, nt),
            in_specs=[
                pl.BlockSpec((bb2, C, t_hw), lambda b, t: (b, 0, t)),
                pl.BlockSpec((Cr, C), lambda b, t: (0, 0)),
                pl.BlockSpec((C, Cr), lambda b, t: (0, 0)),
            ],
            out_specs=pl.BlockSpec((bb2, C, 1), lambda b, t: (b, 0, 0)),
            scratch_shapes=[pltpu.VMEM((bb2, C), jnp.float32),
                            pltpu.VMEM((bb2, C), jnp.float32)],
        ),
        compiler_params=pltpu.CompilerParams(
            dimension_semantics=("parallel", "arbitrary"),
            vmem_limit_bytes=p1_limit),
        cost_estimate=cost1,
    )(xr, w1, w2)

    # Pass 2: scale x by the precomputed attention, fully parallel tiles.
    out = pl.pallas_call(
        _scale_kernel,
        out_shape=jax.ShapeDtypeStruct((B, C, HW), x.dtype),
        grid_spec=pltpu.PrefetchScalarGridSpec(
            num_scalar_prefetch=0,
            grid=(B // bb2, nt),
            in_specs=[
                pl.BlockSpec((bb2, C, t_hw), lambda b, t: (b, 0, t)),
                pl.BlockSpec((bb2, C, 1), lambda b, t: (b, 0, 0)),
            ],
            out_specs=pl.BlockSpec((bb2, C, t_hw), lambda b, t: (b, 0, t)),
        ),
        compiler_params=pltpu.CompilerParams(
            dimension_semantics=("parallel", "parallel"),
            vmem_limit_bytes=p2_limit),
        cost_estimate=cost2,
    )(xr, att)
    return out.reshape(B, C, H, W)


# ---------------------------------------------------------------------------
# Pure-JAX reference matching the PyTorch forward exactly.
# ---------------------------------------------------------------------------
def _reference(x, w1, w2):
    avg = jnp.mean(x, axis=(2, 3), keepdims=True)        # (B, C, 1, 1)
    mx = jnp.max(x, axis=(2, 3), keepdims=True)

    def fc(v):
        h = jnp.einsum('rc,bcij->brij', w1, v)
        h = 0.5 * h * (1.0 + jax.lax.erf(h * _INV_SQRT2))
        return jnp.einsum('cr,brij->bcij', w2, h)

    att = jax.nn.sigmoid(fc(avg) + fc(mx))
    return x * att


def _make_weights(key, C, reduction=16, dtype=jnp.float32):
    Cr = max(1, C // reduction)
    k1, k2 = jax.random.split(key)
    bound1 = 1.0 / math.sqrt(C)
    bound2 = 1.0 / math.sqrt(Cr)
    w1 = jax.random.uniform(k1, (Cr, C), minval=-bound1, maxval=bound1, dtype=dtype)
    w2 = jax.random.uniform(k2, (C, Cr), minval=-bound2, maxval=bound2, dtype=dtype)
    return w1, w2


if __name__ == "__main__":
    key = jax.random.PRNGKey(0)
    kx, kw, kx2, kx3 = jax.random.split(key, 4)

    # --- Case 1: main single-pass path, HW multiple of 128 (16x16). ----------
    B, C, H, W = 2, 4, 16, 16
    x = jax.random.normal(kx, (B, C, H, W), dtype=jnp.float32)
    w1, w2 = _make_weights(kw, C)
    ref = _reference(x, w1, w2)
    out = jax.block_until_ready(channel_attention(x, w1, w2))
    assert out.shape == (B, C, H, W)
    assert jnp.allclose(out, ref, atol=1e-5, rtol=1e-5), "single-pass mismatch"

    # --- Case 2: single-pass with ragged HW (7x7 -> HW=49). ------------------
    x2 = jax.random.normal(kx2, (B, C, 7, 7), dtype=jnp.float32)
    ref2 = _reference(x2, w1, w2)
    out2 = jax.block_until_ready(channel_attention(x2, w1, w2))
    assert jnp.allclose(out2, ref2, atol=1e-5, rtol=1e-5), "ragged single-pass mismatch"

    # --- Case 3: forced two-pass fallback with ragged HW (14x14 -> HW=196). --
    x3 = jax.random.normal(kx3, (B, C, 14, 14), dtype=jnp.float32)
    ref3 = _reference(x3, w1, w2)
    out3 = jax.block_until_ready(
        channel_attention(x3, w1, w2, vmem_budget_bytes=1 << 20))
    assert jnp.allclose(out3, ref3, atol=1e-5, rtol=1e-5), "fallback mismatch"

    print("KERNEL_OK")
</pallas_src>

<mosaic_0001>
module attributes {stable_mosaic.version = 11 : i64} {
  func.func @_ca_fused_kernel(%arg0: i32, %arg1: memref<1x4x256xf32, #tpu.memory_space<vmem>>, %arg2: memref<1x4xf32, #tpu.memory_space<vmem>>, %arg3: memref<4x1xf32, #tpu.memory_space<vmem>>, %arg4: memref<1x4x256xf32, #tpu.memory_space<vmem>>) attributes {dimension_semantics = [#tpu.dimension_semantics<parallel>], iteration_bounds = array<i64: 2>, scalar_prefetch = 0 : i64, scratch_operands = 0 : i64, tpu.core_type = #tpu.core_type<tc>, window_params = [{transform_indices = @transform_0, window_bounds = array<i64: 1, 4, 256>}, {pipeline_mode = #tpu.pipeline_mode<synchronous>, transform_indices = @transform_1, window_bounds = array<i64: 1, 4>}, {pipeline_mode = #tpu.pipeline_mode<synchronous>, transform_indices = @transform_2, window_bounds = array<i64: 4, 1>}, {transform_indices = @transform_3, window_bounds = array<i64: 1, 4, 256>}]} {
    %c0 = arith.constant 0 : index
    %c0_0 = arith.constant 0 : index
    %c0_1 = arith.constant 0 : index
    %0 = vector.load %arg1[%c0, %c0_0, %c0_1] : memref<1x4x256xf32, #tpu.memory_space<vmem>>, vector<1x4x256xf32>
    %cst = arith.constant dense<0.000000e+00> : vector<1x4xf32>
    %1 = vector.multi_reduction <add>, %0, %cst [2] : vector<1x4x256xf32> to vector<1x4xf32>
    %cst_2 = arith.constant dense<0xFF800000> : vector<1x4xf32>
    %2 = vector.multi_reduction <maximumf>, %0, %cst_2 [2] : vector<1x4x256xf32> to vector<1x4xf32>
    %cst_3 = arith.constant 3.906250e-03 : f32
    %3 = vector.broadcast %cst_3 : f32 to vector<1x4xf32>
    %4 = arith.mulf %1, %3 : vector<1x4xf32>
    %5 = tpu.concatenate %4, %2 in 0 : vector<1x4xf32>, vector<1x4xf32> -> vector<2x4xf32>
    %c0_4 = arith.constant 0 : index
    %c0_5 = arith.constant 0 : index
    %6 = vector.load %arg2[%c0_4, %c0_5] : memref<1x4xf32, #tpu.memory_space<vmem>>, vector<1x4xf32>
    %c0_6 = arith.constant 0 : index
    %c0_7 = arith.constant 0 : index
    %7 = vector.load %arg3[%c0_6, %c0_7] : memref<4x1xf32, #tpu.memory_space<vmem>>, vector<4x1xf32>
    "tpu.trace_start"() <{level = 10 : i32, message = "nc,rc->nr"}> : () -> ()
    %cst_8 = arith.constant dense<0.000000e+00> : vector<2x1xf32>
    %8 = tpu.matmul %5, %6, %cst_8 {dimension_numbers = #tpu.dot_dimension_numbers<[1], [1], [0], [0], [0, 0, 1, 0], [], []>} : vector<2x4xf32>, vector<1x4xf32>, vector<2x1xf32> -> vector<2x1xf32>
    "tpu.trace_stop"() : () -> ()
    %cst_9 = arith.constant 5.000000e-01 : f32
    %9 = vector.broadcast %cst_9 : f32 to vector<2x1xf32>
    %10 = arith.mulf %9, %8 : vector<2x1xf32>
    %cst_10 = arith.constant 0.707106769 : f32
    %11 = vector.broadcast %cst_10 : f32 to vector<2x1xf32>
    %12 = arith.mulf %8, %11 : vector<2x1xf32>
    %13 = math.erf %12 : vector<2x1xf32>
    %cst_11 = arith.constant 1.000000e+00 : f32
    %14 = vector.broadcast %cst_11 : f32 to vector<2x1xf32>
    %15 = arith.addf %14, %13 : vector<2x1xf32>
    %16 = arith.mulf %10, %15 : vector<2x1xf32>
    "tpu.trace_start"() <{level = 10 : i32, message = "nr,cr->nc"}> : () -> ()
    %cst_12 = arith.constant dense<0.000000e+00> : vector<2x4xf32>
    %17 = tpu.matmul %16, %7, %cst_12 {dimension_numbers = #tpu.dot_dimension_numbers<[1], [1], [0], [0], [0, 0, 1, 0], [], []>} : vector<2x1xf32>, vector<4x1xf32>, vector<2x4xf32> -> vector<2x4xf32>
    "tpu.trace_stop"() : () -> ()
    %18 = vector.extract_strided_slice %17 {offsets = [0, 0], sizes = [1, 4], strides = [1, 1]} : vector<2x4xf32> to vector<1x4xf32>
    %19 = vector.extract_strided_slice %17 {offsets = [1, 0], sizes = [1, 4], strides = [1, 1]} : vector<2x4xf32> to vector<1x4xf32>
    %20 = arith.addf %18, %19 : vector<1x4xf32>
    %21 = arith.negf %20 : vector<1x4xf32>
    %22 = math.exp %21 : vector<1x4xf32>
    %cst_13 = arith.constant 1.000000e+00 : f32
    %23 = vector.broadcast %cst_13 : f32 to vector<1x4xf32>
    %24 = arith.addf %23, %22 : vector<1x4xf32>
    %25 = arith.divf %23, %24 : vector<1x4xf32>
    %c0_14 = arith.constant 0 : index
    %c0_15 = arith.constant 0 : index
    %c0_16 = arith.constant 0 : index
    %26 = vector.load %arg1[%c0_14, %c0_15, %c0_16] : memref<1x4x256xf32, #tpu.memory_space<vmem>>, vector<1x4x256xf32>
    %27 = vector.shape_cast %25 : vector<1x4xf32> to vector<1x4x1xf32>
    %28 = vector.broadcast %27 : vector<1x4x1xf32> to vector<1x4x256xf32>
    %29 = arith.mulf %26, %28 : vector<1x4x256xf32>
    %c0_17 = arith.constant 0 : index
    %c0_18 = arith.constant 0 : index
    %c0_19 = arith.constant 0 : index
    %30 = vector.load %arg4[%c0_17, %c0_18, %c0_19] : memref<1x4x256xf32, #tpu.memory_space<vmem>>, vector<1x4x256xf32>
    tpu.vector_store %arg4[%c0_17, %c0_18, %c0_19], %29 {strides = array<i32>} : memref<1x4x256xf32, #tpu.memory_space<vmem>>, vector<1x4x256xf32>,
    return
  }
  func.func @transform_0(%arg0: i32) -> (i32, i32, i32) {
    %c0_i32 = arith.constant 0 : i32
    %c0_i32_0 = arith.constant 0 : i32
    %c0_i32_1 = arith.constant 0 : i32
    return %arg0, %c0_i32, %c0_i32_0 : i32, i32, i32
  }
  func.func @transform_1(%arg0: i32) -> (i32, i32) {
    %c0_i32 = arith.constant 0 : i32
    %c0_i32_0 = arith.constant 0 : i32
    %c0_i32_1 = arith.constant 0 : i32
    return %c0_i32, %c0_i32_0 : i32, i32
  }
  func.func @transform_2(%arg0: i32) -> (i32, i32) {
    %c0_i32 = arith.constant 0 : i32
    %c0_i32_0 = arith.constant 0 : i32
    %c0_i32_1 = arith.constant 0 : i32
    return %c0_i32, %c0_i32_0 : i32, i32
  }
  func.func @transform_3(%arg0: i32) -> (i32, i32, i32) {
    %c0_i32 = arith.constant 0 : i32
    %c0_i32_0 = arith.constant 0 : i32
    %c0_i32_1 = arith.constant 0 : i32
    return %arg0, %c0_i32, %c0_i32_0 : i32, i32, i32
  }
}

</mosaic_0001>

<bundles_post_ra>
// kernel: tpu_custom_call.1
= control target key start
LH: loop header
LB: loop body
LE: loop exit
PB: predicated region body
PF: predicated region fallthrough
CT: control target
= control target key end

     0   :  { %8 = vsyncpa [#allocation3], 0  ;;  %s812_s0 = inlined_call_operand.hbm [shape: f32[2,4,256], index: 0, kind: input, shape index: {}]   ;;  %s813_s1 = inlined_call_operand.vmem [shape: f32[1,4], index: 1, kind: input, shape index: {}]   ;;  %s814_s2 = inlined_call_operand.vmem [shape: f32[4,1], index: 2, kind: input, shape index: {}]   ;;  %s815_s3 = inlined_call_operand.hbm [shape: f32[2,4,256], index: 3, kind: output, shape index: {}]  }
   0x1   :  { %10 = vsyncpa [#allocation3 + $0x1], 0 }
   0x2   :  { %11 = vsyncpa [#allocation4], 0 }
   0x3   :  { %13 = vsyncpa [#allocation4 + $0x1], 0  ;;  %s634_s12 = smov 0   ;;  %s636_s13 = smov 0  }
   0x4   :  { %s638_s14 = smov 0   ;;  %s640_s15 = smov 0  }
   0x5 LB: > { %s655_s16 = sadd.s32 4294967295, %s607_s15   ;;  %s428_s17 = sadd.s32 4294967294, %s607_s15   ;;  %s607_s15 = sphi %s640_s15, %s830_s15   ;;  %s603_s14 = sphi %s638_s14, %s829_s14   ;;  %s599_s13 = sphi %s636_s13, %s828_s13   ;;  %s595_s12 = sphi %s634_s12, %s827_s12  }
   0x6   : > { %s659_s18 = sadd.s32 1, %s607_s15   ;;  %s26_s19 = sadd.s32 1, %s603_s14 }
   0x7   : > { %s23_s20 = ssub.s32 %s607_s15, %s659_s18  ;;  %p33_p0 = scmp.ne.s32.totalorder %s603_s14, %s599_s13 }
   0x8   : > { %p24_p1 = scmp.eq.s32.totalorder %s23_s20, 0  ;;  %p34_p2 = scmp.eq.s32.totalorder %s607_s15, 0 }
   0x9   : > { %p39_p3 = scmp.ne.s32.totalorder %s599_s13, %s595_s12  ;;  %p40_p4 = scmp.eq.s32.totalorder %s655_s16, 0 }
   0xa   : > { %s671_s21 = scalar_select %p24_p1, %s603_s14, %s26_s19  }
   0xb   : > { %p673_p5 = por %p34_p2, %p33_p0  ;;  %p677_p6 = por %p40_p4, %p39_p3 }
   0xc   : > { %p105_p7 = scmp.eq.s32.totalorder %s655_s16, 1  ;;  %p111_p8 = scmp.eq.s32.totalorder %s428_s17, 1 }
   0xd   : > { %p467_p10 = scmp.lt.s32.totalorder %s607_s15, 2  ;;  %s137_s26 = sand.u32 1, %s603_s14  }
   0xe   : > { %p684_p11 = por %p105_p7, %p33_p0  ;;  %p688_p12 = por %p111_p8, %p39_p3 }
   0xf   : > { %s446_s27 = sshll.u32 %s607_s15, 7  ;;  %s431_s28 = sshll.u32 %s137_s26, 3 }
  0x10   : > { %s819_s24 = scalar_select %p684_p11, 1, 0 }
  0x11   : > { %s820_s25 = scalar_select %p688_p12, 1, 0 }
  0x12   : > { %s697_s4 = scalar_lea.hbm %s812_s0, %s446_s27  ;;  %s141_s5 = scalar_lea.vmem [#allocation2], %s431_s28 }
  0x13   : > { %s149_s6 = sshll.u32 %s141_s5, 4  ;;  %p701_p13 = pnand %p467_p10, %p673_p5  ;;  %s705_s6 = int_to_ptr.vmem [resolvable:$true] %s149_s6 }
  0x14   : > { %s138_s8 = scalar_lea.sflag [#allocation3], %s137_s26  ;;  %s511_s9 = scalar_lea.hbm %s697_s4, 128 }
  0x15   : > { %p512_p2 = scmp.ne.s32.totalorder %s697_s4, %s511_s9  ;;  %p513_p3 = pneg %p701_p13 }
  0x16   : > { %s516_s17 = scalar_lea.hbm %s812_s0, 256  ;;  %p517_p5 = scmp.lt.u32.totalorder %s697_s4, %s812_s0 }
  0x17   : > { %p514_p4 = pnand %p513_p3, %p512_p2  ;;  %p518_p8 = scmp.lt.u32.totalorder %s516_s17, %s511_s9 }
  0x18   : > { %p520_p9 = scmp.lt.u32.totalorder %s511_s9, %s697_s4 }
  0x19   : > { %p515_p7 = pneg %p514_p4  ;;  %p519_p10 = por %p518_p8, %p517_p5 }
  0x1b   : > { %p521_p0 = por %p520_p9, %p519_p10 }
  0x1d   : > { %p522_p1 = pnand %p521_p0, %p515_p7 }
  0x1f   : > { %525 = shalt.err (!%p522_p1)
}
  0x20   : > { %s526_s22 = scalar_lea.vmem %s705_s6, 128  ;;  %s609_s26 = smov [#allocation2]  }
  0x21   : > { %p527_p2 = scmp.ne.s32.totalorder %s705_s6, %s526_s22  ;;  %s531_s27 = sshll.u32 %s609_s26, 4  ;;  %s532_s27 = int_to_ptr.vmem [resolvable:$false] %s531_s27 }
  0x22   : > { %s533_s28 = scalar_lea.vmem %s532_s27, 256  ;;  %p534_p11 = scmp.lt.s32.totalorder %s705_s6, %s532_s27 }
  0x23   : > { %p529_p4 = pnand %p527_p2, %p513_p3  ;;  %p535_p5 = scmp.lt.s32.totalorder %s533_s28, %s526_s22 }
  0x25   : > { %p530_p12 = pneg %p529_p4  ;;  %p536_p8 = por %p535_p5, %p534_p11 }
  0x27   : > { %p537_p9 = pnand %p536_p8, %p530_p12 }
  0x29   : > { %540 = shalt.err (!%p537_p9)
}
  0x2a   : > { %462 = dma.hbm_to_vmem [thread:$0]  (!%p701_p13), %s697_s4, 128, %s705_s6, %s138_s8  }
  0x2b   : > { %p822_p0 = scmp.lt.s32.totalorder %s607_s15, 3  ;;  %p823_p1 = scmp.ge.s32.totalorder %s607_s15, 1 }
  0x2d   : > { %p155_p3 = pnand %p823_p1, %p822_p0 }
  0x2e   : > { %s739_s29 = sand.u32 (!%p155_p3), 1, %s599_s13  }
  0x2f   : > { %158 = sbr.rel (%p155_p3) target bundleno = 749 (0x2ed), region = 32  ;;  %s435_s30 = sshll.u32 (!%p155_p3), %s739_s29, 3 }
  0x30   : > { %s161_s5 = scalar_lea.sflag (!%p155_p3), [#allocation3], %s739_s29  ;;  %s164_s7 = scalar_lea.vmem (!%p155_p3), [#allocation2], %s435_s30 }
  0x36   : > { %586 = dma.done.wait (%p677_p6), %s161_s5, 128  }
  0x37   : > { %588 = vsyncadd (%p677_p6), %s161_s5, 4294967168  ;;  %vm191_vm0 = vcmask 1043456   ;;  %v749_v0 = vld [vmem:[%s164_s7] sm:$0xff]  ;;  %v204_v8 = vlaneseq  ;;  %vm217_vm1 = vcmask 1040384   ;;  %vm228_vm2 = vcmask 25600   ;;  %s447_s9 = sshll.u32 %s655_s16, 7 }
  0x38   : > { %v189_v1 = vcombine.high %v749_v0, %v749_v0  ;;  %v192_v2 = vsel %vm191_vm0, %v749_v0, 0.0  ;;  %v197_v4 = vsel %vm191_vm0, %v749_v0, -inf  ;;  %v437_v17 = vld [vmem:[%s813_s1] ss:$0 sm:$0xff]  ;;  %v610_v21 = vmov 0.0   ;;  %s186_s10 = scalar_lea.vmem [#allocation5], %s435_s30  ;;  %s768_s20 = scalar_lea.hbm %s815_s3, %s447_s9 }
  0x39   : > { %v205_v9 = vand.u32 127, %v204_v8  ;;  %v207_v10 = vshrl.u32 %v204_v8, 7  ;;  %450 = vmatprep.subr.mxu0 %v610_v21  ;;  %v220_v22 = vld [vmem:[%s814_s2] sm:$0xf]  ;;  %vm237_vm3 = vcmask 7168   ;;  %vm611_vm4 = vmmov 0  }
  0x3a   : > { %v193_v3 = vsel %vm191_vm0, %v189_v1, 0.0  ;;  %v198_v5 = vsel %vm191_vm0, %v189_v1, -inf  ;;  %451 = vmatpush3.xpose.msk.msra.mxu0 %vm237_vm3, %v220_v22  ;;  %452 = vmatprep.mubr.msk.f32.mxu0 %vm611_vm4, %v610_v21  ;;  %v612_v39 = vmov 839922192   ;;  %s358_s11 = sshll.u32 %s186_s10, 4  ;;  %s344_s22 = scalar_lea.sflag [#allocation4], %s739_s29  ;;  %s770_s11 = int_to_ptr.vmem [resolvable:$true] %s358_s11 }
  0x3b   : > { %v194_v6 = vadd.f32 %v193_v3, %v192_v2  ;;  %v199_v7 = vmax.f32 %v197_v4, %v198_v5  ;;  %v208_v12 = vsub.s32 %v205_v9, %v207_v10  ;;  %v327_v36 = vsub.s32 0, %v207_v10  ;;  %s541_s26 = scalar_lea.vmem %s770_s11, 128  ;;  %p824_p11 = scmp.ne.s32.totalorder %s819_s24, 0 }
  0x3c   : > { %v334_v40 = vunpack.c.l.s4 %v612_v39  ;;  %p542_p6 = scmp.ne.s32.totalorder %s770_s11, %s541_s26  ;;  %s613_s16 = smov [#allocation5]  }
  0x3d   : > { %195 = vadd.xlane.f32.xlu0 %v194_v6  ;;  %s545_s27 = sshll.u32 %s613_s16, 4  ;;  %s546_s27 = int_to_ptr.vmem [resolvable:$false] %s545_s27 }
  0x3e   : > { %v335_v41 = vunpack.c.0.s8 %v334_v40  ;;  %p543_p12 = pnand %p542_p6, %p824_p11  ;;  %s547_s28 = scalar_lea.vmem %s546_s27, 256 }
  0x3f   : > { %p548_p7 = scmp.lt.s32.totalorder %s770_s11, %s546_s27  ;;  %p549_p10 = scmp.lt.s32.totalorder %s547_s28, %s541_s26 }
  0x40   : > { %v338_v42 = vsub.s32 %v335_v41, %v207_v10  ;;  %p544_p13 = pneg %p543_p12 }
  0x41   : > { %200 = vmax.xlane.f32.xlu0 %v199_v7  ;;  %p550_p2 = por %p549_p10, %p548_p7 }
  0x43   : > { %p551_p4 = pnand %p550_p2, %p544_p13 }
  0xca   : > { %v196_v11 = vpop.xlane.xlu0 %195 }
  0xcb   : > { %v202_v13 = vmul.f32 0.00390625, %v196_v11 }
  0xcd   : > { %v209_v15 = vrot.slane %v202_v13, %v208_v12 }
  0xce   : > { %v201_v14 = vpop.xlane.xlu0 %200 }
  0xcf   : > { %v215_v16 = vrot.slane %v201_v14, %v208_v12 }
  0xd1   : > { %v218_v18 = vsel %vm217_vm1, %v209_v15, %v215_v16 }
  0xd2   : > { %v227_v19 = vmul.f32 %v437_v17, %v218_v18 }
  0xd4   : > { %v229_v20 = vsel %vm228_vm2, %v227_v19, 0.0 }
  0xd5   : > { %230 = vadd.xlane.f32.xlu1 %v229_v20 }
 0x162   : > { %v231_v23 = vpop.xlane.xlu1 %230 }
 0x163   : > { %v233_v24 = vmul.f32 0.70710677, %v231_v23  ;;  %v232_v26 = vmul.f32 0.5, %v231_v23 }
 0x165   : > { %505 = verf.f32 %v233_v24 }
 0x16f   : > { %v506_v25 = vpop.eup %505 }
 0x170   : > { %v235_v27 = vadd.f32 1.0, %v506_v25 }
 0x172   : > { %v236_v28 = vmul.f32 %v235_v27, %v232_v26 }
 0x174   : > { %453 = vmatmul.mubr.msk.f32.vlgmr.msra.gmra.mrb[0].mxu0 %vm237_vm3, %v236_v28 }
 0x247   : > { %v310_v29 = vpop.f32.mrb[0].mxu0 }
 0x248   : > { %v315_v30 = vrot.slane %v310_v29, 1  ;;  %v454_v31 = vpop.f32.mrb[1].mxu0 }
 0x24a   : > { %v317_v32 = vadd.f32 %v315_v30, %v310_v29 }
 0x24c   : > { %v440_v33 = vmul.f32 -1.442695, %v317_v32 }
 0x24e   : > { %507 = vpow2.f32 %v440_v33 }
 0x258   : > { %v508_v34 = vpop.eup %507 }
 0x259   : > { %v321_v35 = vadd.f32 1.0, %v508_v34 }
 0x25b   : > { %509 = vrcp.f32 %v321_v35 }
 0x265   : > { %v510_v37 = vpop.eup %509 }
 0x266   : > { %v328_v38 = vrot.slane %v510_v37, %v327_v36 }
 0x268   : > { %330 = vbcast.lane.b32.xlu1 %v328_v38, 256 }
 0x2da   : > { %v331_v43 = vpop.permute.xlu1 %330 }
 0x2db   : > { %v339_v44 = vrot.slane %v331_v43, %v338_v42 }
 0x2dd   : > { %v341_v45 = vmul.f32 %v339_v44, %v749_v0 }
 0x2df   : > { %342 = vst [vmem:[%s186_s10] sm:$0xff] %v341_v45 }
 0x2e0   : > { %554 = shalt.err (!%p551_p4)
}
 0x2e1   : > { %s555_s29 = scalar_lea.hbm %s768_s20, 128  ;;  %s559_s7 = scalar_lea.hbm %s815_s3, 256 }
 0x2e2   : > { %p556_p5 = scmp.ne.s32.totalorder %s768_s20, %s555_s29  ;;  %p560_p0 = scmp.lt.u32.totalorder %s768_s20, %s815_s3 }
 0x2e3   : > { %p561_p1 = scmp.lt.u32.totalorder %s559_s7, %s555_s29  ;;  %p563_p6 = scmp.lt.u32.totalorder %s555_s29, %s768_s20 }
 0x2e4   : > { %p557_p8 = pnand %p556_p5, %p824_p11 }
 0x2e5   : > { %p562_p3 = por %p561_p1, %p560_p0 }
 0x2e6   : > { %p558_p9 = pneg %p557_p8 }
 0x2e7   : > { %p564_p12 = por %p563_p6, %p562_p3 }
 0x2e9   : > { %p565_p13 = pnand %p564_p12, %p558_p9 }
 0x2eb   : > { %568 = shalt.err (!%p565_p13)
}
 0x2ec   : > { %457 = dma.vmem_to_hbm [thread:$0]  (%p824_p11), %s770_s11, 128, %s768_s20, %s344_s22  }
 0x2ed PF: > { %s370_s6 = sand.u32 1, %s595_s12   ;;  %p825_p7 = scmp.ne.s32.totalorder %s820_s25, 0 }
 0x2ee   : > { %p826_p10 = scmp.ge.s32.totalorder %s607_s15, 2  ;;  %s371_s8 = scalar_lea.sflag [#allocation4], %s370_s6 }
 0x2f0   : > { %p464_p2 = pnand %p826_p10, %p825_p7 }
 0x2f2   : > { %590 = dma.done.wait (!%p464_p2), %s371_s8, 128  }
 0x2f3   : > { %592 = vsyncadd (!%p464_p2), %s371_s8, 4294967168  ;;  %p16_p4 = scmp.ge.s32.totalorder %s659_s18, 4   ;;  %s827_s12 = smov %s599_s13 }
 0x2f4   : > { %s828_s13 = smov %s603_s14  ;;  %s829_s14 = smov %s671_s21 }
 0x2f5   : > { %s830_s15 = smov %s659_s18  ;;  %18 = sbr.rel (!%p16_p4) target bundleno = 5 (0x5), region = 77 }
 0x2fc   :  { %376 = vsyncpa [#allocation3], 1 }
 0x2fd   :  { %378 = vsyncpa [#allocation3 + $0x1], 1 }
 0x2fe   :  { %379 = vsyncpa [#allocation4], 1 }
 0x2ff   :  { %381 = vsyncpa [#allocation4 + $0x1], 1 }

</bundles_post_ra>
